<compile_context>
chip_gen: v5e
topology: v5e:2x2
jax: 0.10.0
libtpu: 0.0.40
codegen_flags: <defaults>
</compile_context>

<pallas_src>
import jax
import jax.numpy as jnp
from jax import lax
from jax.experimental import pallas as pl
from jax.experimental.pallas import tpu as pltpu


def _round_up(v, m):
    return ((v + m - 1) // m) * m


def _cdiv(a, b):
    return -(-a // b)


# ---------------------------------------------------------------------------
# Kernel 1: per-point shared MLP (3 x [bf16 matmul, f32 *scale+shift, relu])
# fused with the max-pool over points.  Grid = (split, B, point-tiles).
# ---------------------------------------------------------------------------
def _point_mlp_pool_kernel(x_ref, w1_ref, s1_ref, b1_ref,
                           w2_ref, s2_ref, b2_ref,
                           w3_ref, s3_ref, b3_ref, o_ref):
    n = pl.program_id(2)

    xb = x_ref[0].astype(jnp.bfloat16)                        # (k, TN) bf16
    # Transposed-LHS contraction (k, TN)^T @ (k, 64) -> (TN, 64), MXU native.
    h = lax.dot_general(xb, w1_ref[...],
                        dimension_numbers=(((0,), (0,)), ((), ())),
                        preferred_element_type=jnp.float32)
    h = jnp.maximum(h * s1_ref[...] + b1_ref[...], 0.0)       # (TN, 64) f32
    h = jnp.dot(h.astype(jnp.bfloat16), w2_ref[...],
                preferred_element_type=jnp.float32)
    h = jnp.maximum(h * s2_ref[...] + b2_ref[...], 0.0)       # (TN, 128) f32
    h = jnp.dot(h.astype(jnp.bfloat16), w3_ref[...],
                preferred_element_type=jnp.float32)
    h = jnp.maximum(h * s3_ref[...] + b3_ref[...], 0.0)       # (TN, 1024) f32

    tile_max = jnp.max(h, axis=0, keepdims=True)              # (1, 1024)

    @pl.when(n == 0)
    def _init():
        # ReLU output is >= 0, so 0 is a safe identity for the running max.
        o_ref[...] = jnp.zeros_like(o_ref)

    o_ref[0] = jnp.maximum(o_ref[0], tile_max)


# ---------------------------------------------------------------------------
# Kernel 2: FC head (fc1+bn4+relu, fc2+bn5+relu, fc3 + folded identity).
# Grid = (batch_row_tiles,).
# ---------------------------------------------------------------------------
def _head_mlp_kernel(x_ref, w4_ref, s4_ref, b4_ref,
                     w5_ref, s5_ref, b5_ref,
                     w6_ref, b6_ref, o_ref):
    h = x_ref[...].astype(jnp.bfloat16)                       # (TB, 1024)
    h = jnp.dot(h, w4_ref[...], preferred_element_type=jnp.float32)
    h = jnp.maximum(h * s4_ref[...] + b4_ref[...], 0.0)       # (TB, 512) f32
    h = jnp.dot(h.astype(jnp.bfloat16), w5_ref[...],
                preferred_element_type=jnp.float32)
    h = jnp.maximum(h * s5_ref[...] + b5_ref[...], 0.0)       # (TB, 256) f32
    h = jnp.dot(h.astype(jnp.bfloat16), w6_ref[...],
                preferred_element_type=jnp.float32)
    o_ref[...] = (h + b6_ref[...]).astype(o_ref.dtype)        # (TB, kk_pad)


# ---------------------------------------------------------------------------
# Parameter folding / tiling helpers
# ---------------------------------------------------------------------------
def _fold_bn(layer, eps=1e-5):
    """Fold conv/linear bias + eval-mode BatchNorm into (scale, shift)."""
    scale = layer['gamma'] / jnp.sqrt(layer['var'] + eps)
    shift = layer['beta'] + (layer['b'] - layer['mean']) * scale
    return (scale.reshape(1, -1).astype(jnp.float32),
            shift.reshape(1, -1).astype(jnp.float32))


def _stage1_tiling(N, tile_n, split):
    """Pick (TN, tiles_per_split, padded_N, split).

    The x block's last (lane) dim must be a multiple of 128 unless it equals
    the full (padded) point extent, so small N uses a single full-extent tile.
    """
    tile_n = max(128, (tile_n // 128) * 128)
    if split < 2 or N < split * 128:
        split = 1
    if split == 1 and N <= tile_n:
        return N, 1, N, 1
    tn0 = min(tile_n, _round_up(_cdiv(N, split), 128))
    n_per = _cdiv(N, split * tn0)
    tn = min(tn0, _round_up(_cdiv(N, split * n_per), 128))
    return tn, n_per, split * n_per * tn, split


# ---------------------------------------------------------------------------
# Wrapper
# ---------------------------------------------------------------------------
def stnkd_forward(x, p, *, tile_n=2048, tile_b=256, point_split=2, eps=1e-5):
    """Pallas implementation of STNkd.forward.  x: (B, k, N) -> (B, k, k)."""
    B, k, N = x.shape
    x = x.astype(jnp.float32)

    # Fold BN (eval mode) into per-channel scale/shift; weights go bf16.
    s1, sh1 = _fold_bn(p['c1'], eps)
    s2, sh2 = _fold_bn(p['c2'], eps)
    s3, sh3 = _fold_bn(p['c3'], eps)
    s4, sh4 = _fold_bn(p['f1'], eps)
    s5, sh5 = _fold_bn(p['f2'], eps)

    w1 = p['c1']['w'].astype(jnp.bfloat16)
    w2 = p['c2']['w'].astype(jnp.bfloat16)
    w3 = p['c3']['w'].astype(jnp.bfloat16)
    w4 = p['f1']['w'].astype(jnp.bfloat16)
    w5 = p['f2']['w'].astype(jnp.bfloat16)
    w6 = p['f3']['w'].astype(jnp.bfloat16)

    c1, c2, c3 = w1.shape[1], w2.shape[1], w3.shape[1]
    c4, c5, kk = w4.shape[1], w5.shape[1], w6.shape[1]

    # fc3 has no BN; fold +identity into its bias (same for every batch row).
    sh6 = (p['f3']['b'].astype(jnp.float32)
           + jnp.eye(k, dtype=jnp.float32).reshape(-1)).reshape(1, -1)
    # Pad fc3 output channels to a lane-dense multiple of 128 (k*k is tiny
    # for small k) to avoid masked partial stores; sliced off afterwards.
    kk_pad = _round_up(kk, 128)
    if kk_pad != kk:
        w6 = jnp.pad(w6, ((0, 0), (0, kk_pad - kk)))
        sh6 = jnp.pad(sh6, ((0, 0), (0, kk_pad - kk)))

    # ------------------- stage 1: shared point MLP + max pool --------------
    TN, n_per, Np, split = _stage1_tiling(N, tile_n, point_split)
    if Np != N:
        # Edge-pad the point axis: duplicated points cannot change the max,
        # so no in-kernel masking is needed.
        xp = jnp.pad(x, ((0, 0), (0, 0), (0, Np - N)), mode='edge')
    else:
        xp = x

    pooled3 = pl.pallas_call(
        _point_mlp_pool_kernel,
        out_shape=jax.ShapeDtypeStruct((split * B, 1, c3), jnp.float32),
        grid=(split, B, n_per),
        in_specs=[
            pl.BlockSpec((1, k, TN), lambda c, b, n: (b, 0, c * n_per + n)),
            pl.BlockSpec((k, c1), lambda c, b, n: (0, 0)),
            pl.BlockSpec((1, c1), lambda c, b, n: (0, 0)),
            pl.BlockSpec((1, c1), lambda c, b, n: (0, 0)),
            pl.BlockSpec((c1, c2), lambda c, b, n: (0, 0)),
            pl.BlockSpec((1, c2), lambda c, b, n: (0, 0)),
            pl.BlockSpec((1, c2), lambda c, b, n: (0, 0)),
            pl.BlockSpec((c2, c3), lambda c, b, n: (0, 0)),
            pl.BlockSpec((1, c3), lambda c, b, n: (0, 0)),
            pl.BlockSpec((1, c3), lambda c, b, n: (0, 0)),
        ],
        out_specs=pl.BlockSpec((1, 1, c3), lambda c, b, n: (b * split + c, 0, 0)),
        compiler_params=pltpu.CompilerParams(
            dimension_semantics=("parallel", "parallel", "arbitrary"),
            vmem_limit_bytes=32 * 1024 * 1024),
        cost_estimate=pl.CostEstimate(
            flops=2 * B * Np * (k * c1 + c1 * c2 + c2 * c3),
            transcendentals=0,
            bytes_accessed=(4 * B * Np * k
                            + 2 * (k * c1 + c1 * c2 + c2 * c3)
                            + 4 * (c1 + c2 + c3) * 2
                            + 4 * split * B * c3),
        ),
    )(xp, w1, s1, sh1, w2, s2, sh2, w3, s3, sh3)

    pooled = pooled3.reshape(B, split, c3)
    pooled = jnp.max(pooled, axis=1) if split > 1 else pooled[:, 0, :]

    # ------------------- stage 2: FC head -----------------------------------
    if B <= tile_b:
        TB, Bp, pooled_p = B, B, pooled
    else:
        TB = tile_b
        Bp = _round_up(B, TB)
        pooled_p = jnp.pad(pooled, ((0, Bp - B), (0, 0)))

    out = pl.pallas_call(
        _head_mlp_kernel,
        out_shape=jax.ShapeDtypeStruct((Bp, kk_pad), jnp.float32),
        grid=(Bp // TB,),
        in_specs=[
            pl.BlockSpec((TB, c3), lambda i: (i, 0)),
            pl.BlockSpec((c3, c4), lambda i: (0, 0)),
            pl.BlockSpec((1, c4), lambda i: (0, 0)),
            pl.BlockSpec((1, c4), lambda i: (0, 0)),
            pl.BlockSpec((c4, c5), lambda i: (0, 0)),
            pl.BlockSpec((1, c5), lambda i: (0, 0)),
            pl.BlockSpec((1, c5), lambda i: (0, 0)),
            pl.BlockSpec((c5, kk_pad), lambda i: (0, 0)),
            pl.BlockSpec((1, kk_pad), lambda i: (0, 0)),
        ],
        out_specs=pl.BlockSpec((TB, kk_pad), lambda i: (i, 0)),
        compiler_params=pltpu.CompilerParams(
            dimension_semantics=("parallel",)),
        cost_estimate=pl.CostEstimate(
            flops=2 * Bp * (c3 * c4 + c4 * c5 + c5 * kk_pad),
            transcendentals=0,
            bytes_accessed=(4 * Bp * c3
                            + 2 * (c3 * c4 + c4 * c5 + c5 * kk_pad)
                            + 4 * Bp * kk_pad),
        ),
    )(pooled_p, w4, s4, sh4, w5, s5, sh5, w6, sh6)

    out = out[:B, :kk]
    return out.reshape(B, k, k)


# ---------------------------------------------------------------------------
# Deterministic parameters + pure-JAX reference
# ---------------------------------------------------------------------------
def make_params(key, k):
    specs = [('c1', k, 64), ('c2', 64, 128), ('c3', 128, 1024),
             ('f1', 1024, 512), ('f2', 512, 256)]
    p = {}
    for name, cin, cout in specs:
        key, k1, k2, k3, k4, k5, k6 = jax.random.split(key, 7)
        p[name] = dict(
            w=0.1 * jax.random.normal(k1, (cin, cout), jnp.float32),
            b=0.1 * jax.random.normal(k2, (cout,), jnp.float32),
            gamma=1.0 + 0.1 * jax.random.normal(k3, (cout,), jnp.float32),
            beta=0.1 * jax.random.normal(k4, (cout,), jnp.float32),
            mean=0.1 * jax.random.normal(k5, (cout,), jnp.float32),
            var=0.5 + jax.random.uniform(k6, (cout,), jnp.float32),
        )
    key, k1, k2 = jax.random.split(key, 3)
    p['f3'] = dict(
        w=0.1 * jax.random.normal(k1, (256, k * k), jnp.float32),
        b=0.1 * jax.random.normal(k2, (k * k,), jnp.float32),
    )
    return p


def stnkd_ref(x, p, eps=1e-5):
    B, k, N = x.shape
    h = jnp.transpose(x, (0, 2, 1)).reshape(B * N, k)
    for name in ('c1', 'c2', 'c3'):
        L = p[name]
        h = h @ L['w'] + L['b']
        h = (h - L['mean']) / jnp.sqrt(L['var'] + eps) * L['gamma'] + L['beta']
        h = jnp.maximum(h, 0.0)
    h = h.reshape(B, N, -1).max(axis=1)
    for name in ('f1', 'f2'):
        L = p[name]
        h = h @ L['w'] + L['b']
        h = (h - L['mean']) / jnp.sqrt(L['var'] + eps) * L['gamma'] + L['beta']
        h = jnp.maximum(h, 0.0)
    h = h @ p['f3']['w'] + p['f3']['b'] + jnp.eye(k).reshape(1, k * k)
    return h.reshape(B, k, k)


if __name__ == "__main__":
    key = jax.random.PRNGKey(0)
    B, k, N = 2, 4, 16            # small: batch=2, k=4 channels, 16 points

    key, xkey, pkey = jax.random.split(key, 3)
    x = jax.random.normal(xkey, (B, k, N), dtype=jnp.float32)
    params = make_params(pkey, k)

    out = stnkd_forward(x, params)
    out = jax.block_until_ready(out)

    ref = stnkd_ref(x, params)
    assert out.shape == (B, k, k), out.shape
    err = float(jnp.max(jnp.abs(out - ref)))
    ref_scale = float(jnp.max(jnp.abs(ref))) + 1e-6
    assert err <= 2e-2 * ref_scale + 1e-3, (err, ref_scale)

    print("KERNEL_OK")
</pallas_src>

<mosaic_0001>
module attributes {stable_mosaic.version = 11 : i64} {
  func.func @_point_mlp_pool_kernel(%arg0: i32, %arg1: i32, %arg2: i32, %arg3: memref<1x4x16xf32, #tpu.memory_space<vmem>>, %arg4: memref<4x64xbf16, #tpu.memory_space<vmem>>, %arg5: memref<1x64xf32, #tpu.memory_space<vmem>>, %arg6: memref<1x64xf32, #tpu.memory_space<vmem>>, %arg7: memref<64x128xbf16, #tpu.memory_space<vmem>>, %arg8: memref<1x128xf32, #tpu.memory_space<vmem>>, %arg9: memref<1x128xf32, #tpu.memory_space<vmem>>, %arg10: memref<128x1024xbf16, #tpu.memory_space<vmem>>, %arg11: memref<1x1024xf32, #tpu.memory_space<vmem>>, %arg12: memref<1x1024xf32, #tpu.memory_space<vmem>>, %arg13: memref<1x1x1024xf32, #tpu.memory_space<vmem>>) attributes {dimension_semantics = [#tpu.dimension_semantics<parallel>, #tpu.dimension_semantics<parallel>, #tpu.dimension_semantics<arbitrary>], iteration_bounds = array<i64: 1, 2, 1>, scalar_prefetch = 0 : i64, scratch_operands = 0 : i64, tpu.core_type = #tpu.core_type<tc>, window_params = [{transform_indices = @transform_0, window_bounds = array<i64: 1, 4, 16>}, {pipeline_mode = #tpu.pipeline_mode<synchronous>, transform_indices = @transform_1, window_bounds = array<i64: 4, 64>}, {pipeline_mode = #tpu.pipeline_mode<synchronous>, transform_indices = @transform_2, window_bounds = array<i64: 1, 64>}, {pipeline_mode = #tpu.pipeline_mode<synchronous>, transform_indices = @transform_3, window_bounds = array<i64: 1, 64>}, {pipeline_mode = #tpu.pipeline_mode<synchronous>, transform_indices = @transform_4, window_bounds = array<i64: 64, 128>}, {pipeline_mode = #tpu.pipeline_mode<synchronous>, transform_indices = @transform_5, window_bounds = array<i64: 1, 128>}, {pipeline_mode = #tpu.pipeline_mode<synchronous>, transform_indices = @transform_6, window_bounds = array<i64: 1, 128>}, {pipeline_mode = #tpu.pipeline_mode<synchronous>, transform_indices = @transform_7, window_bounds = array<i64: 128, 1024>}, {pipeline_mode = #tpu.pipeline_mode<synchronous>, transform_indices = @transform_8, window_bounds = array<i64: 1, 1024>}, {pipeline_mode = #tpu.pipeline_mode<synchronous>, transform_indices = @transform_9, window_bounds = array<i64: 1, 1024>}, {transform_indices = @transform_10, window_bounds = array<i64: 1, 1, 1024>}]} {
    %c0 = arith.constant 0 : index
    %c0_0 = arith.constant 0 : index
    %c0_1 = arith.constant 0 : index
    %0 = vector.load %arg3[%c0, %c0_0, %c0_1] : memref<1x4x16xf32, #tpu.memory_space<vmem>>, vector<1x4x16xf32>
    %1 = vector.shape_cast %0 : vector<1x4x16xf32> to vector<4x16xf32>
    %2 = arith.truncf %1 : vector<4x16xf32> to vector<4x16xbf16>
    %c0_2 = arith.constant 0 : index
    %c0_3 = arith.constant 0 : index
    %3 = vector.load %arg4[%c0_2, %c0_3] : memref<4x64xbf16, #tpu.memory_space<vmem>>, vector<4x64xbf16>
    %cst = arith.constant dense<0.000000e+00> : vector<16x64xf32>
    %4 = tpu.matmul %2, %3, %cst {dimension_numbers = #tpu.dot_dimension_numbers<[0], [0], [1], [1], [0, 1, 1, 1], [], []>} : vector<4x16xbf16>, vector<4x64xbf16>, vector<16x64xf32> -> vector<16x64xf32>
    %c0_4 = arith.constant 0 : index
    %c0_5 = arith.constant 0 : index
    %5 = vector.load %arg5[%c0_4, %c0_5] : memref<1x64xf32, #tpu.memory_space<vmem>>, vector<1x64xf32>
    %6 = vector.broadcast %5 : vector<1x64xf32> to vector<16x64xf32>
    %7 = arith.mulf %4, %6 : vector<16x64xf32>
    %c0_6 = arith.constant 0 : index
    %c0_7 = arith.constant 0 : index
    %8 = vector.load %arg6[%c0_6, %c0_7] : memref<1x64xf32, #tpu.memory_space<vmem>>, vector<1x64xf32>
    %9 = vector.broadcast %8 : vector<1x64xf32> to vector<16x64xf32>
    %10 = arith.addf %7, %9 : vector<16x64xf32>
    %cst_8 = arith.constant 0.000000e+00 : f32
    %11 = vector.broadcast %cst_8 : f32 to vector<16x64xf32>
    %12 = arith.maximumf %10, %11 : vector<16x64xf32>
    %13 = arith.truncf %12 : vector<16x64xf32> to vector<16x64xbf16>
    %c0_9 = arith.constant 0 : index
    %c0_10 = arith.constant 0 : index
    %14 = vector.load %arg7[%c0_9, %c0_10] : memref<64x128xbf16, #tpu.memory_space<vmem>>, vector<64x128xbf16>
    %cst_11 = arith.constant dense<0.000000e+00> : vector<16x128xf32>
    %15 = tpu.matmul %13, %14, %cst_11 {dimension_numbers = #tpu.dot_dimension_numbers<[1], [0], [0], [1], [0, 0, 1, 1], [], []>} : vector<16x64xbf16>, vector<64x128xbf16>, vector<16x128xf32> -> vector<16x128xf32>
    %c0_12 = arith.constant 0 : index
    %c0_13 = arith.constant 0 : index
    %16 = vector.load %arg8[%c0_12, %c0_13] : memref<1x128xf32, #tpu.memory_space<vmem>>, vector<1x128xf32>
    %17 = vector.broadcast %16 : vector<1x128xf32> to vector<16x128xf32>
    %18 = arith.mulf %15, %17 : vector<16x128xf32>
    %c0_14 = arith.constant 0 : index
    %c0_15 = arith.constant 0 : index
    %19 = vector.load %arg9[%c0_14, %c0_15] : memref<1x128xf32, #tpu.memory_space<vmem>>, vector<1x128xf32>
    %20 = vector.broadcast %19 : vector<1x128xf32> to vector<16x128xf32>
    %21 = arith.addf %18, %20 : vector<16x128xf32>
    %cst_16 = arith.constant 0.000000e+00 : f32
    %22 = vector.broadcast %cst_16 : f32 to vector<16x128xf32>
    %23 = arith.maximumf %21, %22 : vector<16x128xf32>
    %24 = arith.truncf %23 : vector<16x128xf32> to vector<16x128xbf16>
    %c0_17 = arith.constant 0 : index
    %c0_18 = arith.constant 0 : index
    %25 = vector.load %arg10[%c0_17, %c0_18] : memref<128x1024xbf16, #tpu.memory_space<vmem>>, vector<128x1024xbf16>
    %cst_19 = arith.constant dense<0.000000e+00> : vector<16x1024xf32>
    %26 = tpu.matmul %24, %25, %cst_19 {dimension_numbers = #tpu.dot_dimension_numbers<[1], [0], [0], [1], [0, 0, 1, 1], [], []>} : vector<16x128xbf16>, vector<128x1024xbf16>, vector<16x1024xf32> -> vector<16x1024xf32>
    %c0_20 = arith.constant 0 : index
    %c0_21 = arith.constant 0 : index
    %27 = vector.load %arg11[%c0_20, %c0_21] : memref<1x1024xf32, #tpu.memory_space<vmem>>, vector<1x1024xf32>
    %28 = vector.broadcast %27 : vector<1x1024xf32> to vector<16x1024xf32>
    %29 = arith.mulf %26, %28 : vector<16x1024xf32>
    %c0_22 = arith.constant 0 : index
    %c0_23 = arith.constant 0 : index
    %30 = vector.load %arg12[%c0_22, %c0_23] : memref<1x1024xf32, #tpu.memory_space<vmem>>, vector<1x1024xf32>
    %31 = vector.broadcast %30 : vector<1x1024xf32> to vector<16x1024xf32>
    %32 = arith.addf %29, %31 : vector<16x1024xf32>
    %cst_24 = arith.constant 0.000000e+00 : f32
    %33 = vector.broadcast %cst_24 : f32 to vector<16x1024xf32>
    %34 = arith.maximumf %32, %33 : vector<16x1024xf32>
    %cst_25 = arith.constant dense<0xFF800000> : vector<1024xf32>
    %35 = vector.multi_reduction <maximumf>, %34, %cst_25 [0] : vector<16x1024xf32> to vector<1024xf32>
    %36 = vector.shape_cast %35 : vector<1024xf32> to vector<1x1024xf32>
    %c0_i32 = arith.constant 0 : i32
    %37 = arith.cmpi eq, %arg2, %c0_i32 : i32
    %38 = arith.extui %37 : i1 to i32
    %c0_i32_26 = arith.constant 0 : i32
    %39 = arith.cmpi ne, %38, %c0_i32_26 : i32
    scf.if %39 {
      %cst_33 = arith.constant 0.000000e+00 : f32
      %46 = vector.broadcast %cst_33 : f32 to vector<1x1x1024xf32>
      %c0_34 = arith.constant 0 : index
      %c0_35 = arith.constant 0 : index
      %c0_36 = arith.constant 0 : index
      %47 = vector.load %arg13[%c0_34, %c0_35, %c0_36] : memref<1x1x1024xf32, #tpu.memory_space<vmem>>, vector<1x1x1024xf32>
      tpu.vector_store %arg13[%c0_34, %c0_35, %c0_36], %46 {strides = array<i32>} : memref<1x1x1024xf32, #tpu.memory_space<vmem>>, vector<1x1x1024xf32>,
    } else {
    }
    %c0_27 = arith.constant 0 : index
    %c0_28 = arith.constant 0 : index
    %c0_29 = arith.constant 0 : index
    %40 = vector.load %arg13[%c0_27, %c0_28, %c0_29] : memref<1x1x1024xf32, #tpu.memory_space<vmem>>, vector<1x1x1024xf32>
    %41 = vector.shape_cast %40 : vector<1x1x1024xf32> to vector<1x1024xf32>
    %42 = arith.maximumf %41, %36 : vector<1x1024xf32>
    %c0_30 = arith.constant 0 : index
    %c0_31 = arith.constant 0 : index
    %c0_32 = arith.constant 0 : index
    %43 = vector.load %arg13[%c0_30, %c0_31, %c0_32] : memref<1x1x1024xf32, #tpu.memory_space<vmem>>, vector<1x1x1024xf32>
    %44 = vector.shape_cast %43 : vector<1x1x1024xf32> to vector<1x1024xf32>
    %45 = vector.shape_cast %42 : vector<1x1024xf32> to vector<1x1x1024xf32>
    tpu.vector_store %arg13[%c0_30, %c0_31, %c0_32], %45 {strides = array<i32>} : memref<1x1x1024xf32, #tpu.memory_space<vmem>>, vector<1x1x1024xf32>,
    return
  }
  func.func @transform_0(%arg0: i32, %arg1: i32, %arg2: i32) -> (i32, i32, i32) {
    %c1_i32 = arith.constant 1 : i32
    %0 = arith.muli %arg0, %c1_i32 : i32
    %1 = arith.addi %0, %arg2 : i32
    %c0_i32 = arith.constant 0 : i32
    %c0_i32_0 = arith.constant 0 : i32
    return %arg1, %c0_i32, %1 : i32, i32, i32
  }
  func.func @transform_1(%arg0: i32, %arg1: i32, %arg2: i32) -> (i32, i32) {
    %c0_i32 = arith.constant 0 : i32
    %c0_i32_0 = arith.constant 0 : i32
    %c0_i32_1 = arith.constant 0 : i32
    return %c0_i32, %c0_i32_0 : i32, i32
  }
  func.func @transform_2(%arg0: i32, %arg1: i32, %arg2: i32) -> (i32, i32) {
    %c0_i32 = arith.constant 0 : i32
    %c0_i32_0 = arith.constant 0 : i32
    %c0_i32_1 = arith.constant 0 : i32
    return %c0_i32, %c0_i32_0 : i32, i32
  }
  func.func @transform_3(%arg0: i32, %arg1: i32, %arg2: i32) -> (i32, i32) {
    %c0_i32 = arith.constant 0 : i32
    %c0_i32_0 = arith.constant 0 : i32
    %c0_i32_1 = arith.constant 0 : i32
    return %c0_i32, %c0_i32_0 : i32, i32
  }
  func.func @transform_4(%arg0: i32, %arg1: i32, %arg2: i32) -> (i32, i32) {
    %c0_i32 = arith.constant 0 : i32
    %c0_i32_0 = arith.constant 0 : i32
    %c0_i32_1 = arith.constant 0 : i32
    return %c0_i32, %c0_i32_0 : i32, i32
  }
  func.func @transform_5(%arg0: i32, %arg1: i32, %arg2: i32) -> (i32, i32) {
    %c0_i32 = arith.constant 0 : i32
    %c0_i32_0 = arith.constant 0 : i32
    %c0_i32_1 = arith.constant 0 : i32
    return %c0_i32, %c0_i32_0 : i32, i32
  }
  func.func @transform_6(%arg0: i32, %arg1: i32, %arg2: i32) -> (i32, i32) {
    %c0_i32 = arith.constant 0 : i32
    %c0_i32_0 = arith.constant 0 : i32
    %c0_i32_1 = arith.constant 0 : i32
    return %c0_i32, %c0_i32_0 : i32, i32
  }
  func.func @transform_7(%arg0: i32, %arg1: i32, %arg2: i32) -> (i32, i32) {
    %c0_i32 = arith.constant 0 : i32
    %c0_i32_0 = arith.constant 0 : i32
    %c0_i32_1 = arith.constant 0 : i32
    return %c0_i32, %c0_i32_0 : i32, i32
  }
  func.func @transform_8(%arg0: i32, %arg1: i32, %arg2: i32) -> (i32, i32) {
    %c0_i32 = arith.constant 0 : i32
    %c0_i32_0 = arith.constant 0 : i32
    %c0_i32_1 = arith.constant 0 : i32
    return %c0_i32, %c0_i32_0 : i32, i32
  }
  func.func @transform_9(%arg0: i32, %arg1: i32, %arg2: i32) -> (i32, i32) {
    %c0_i32 = arith.constant 0 : i32
    %c0_i32_0 = arith.constant 0 : i32
    %c0_i32_1 = arith.constant 0 : i32
    return %c0_i32, %c0_i32_0 : i32, i32
  }
  func.func @transform_10(%arg0: i32, %arg1: i32, %arg2: i32) -> (i32, i32, i32) {
    %c1_i32 = arith.constant 1 : i32
    %0 = arith.muli %arg1, %c1_i32 : i32
    %1 = arith.addi %0, %arg0 : i32
    %c0_i32 = arith.constant 0 : i32
    %c0_i32_0 = arith.constant 0 : i32
    %c0_i32_1 = arith.constant 0 : i32
    return %1, %c0_i32, %c0_i32_0 : i32, i32, i32
  }
}

</mosaic_0001>

<bundles_post_ra>
// kernel: tpu_custom_call.1
= control target key start
LH: loop header
LB: loop body
LE: loop exit
PB: predicated region body
PF: predicated region fallthrough
CT: control target
= control target key end

     0   :  { %s2679_s0 = inlined_call_operand.hbm [shape: f32[2,4,16], index: 0, kind: input, shape index: {}]   ;;  %s2680_s1 = inlined_call_operand.hbm [shape: bf16[4,64], index: 1, kind: input, shape index: {}]   ;;  %s2681_s2 = inlined_call_operand.hbm [shape: f32[1,64], index: 2, kind: input, shape index: {}]   ;;  %s2682_s3 = inlined_call_operand.hbm [shape: f32[1,64], index: 3, kind: input, shape index: {}]   ;;  %s2683_s4 = inlined_call_operand.hbm [shape: bf16[64,128], index: 4, kind: input, shape index: {}]   ;;  %s2684_s5 = inlined_call_operand.hbm [shape: f32[1,128], index: 5, kind: input, shape index: {}]   ;;  %s2685_s6 = inlined_call_operand.hbm [shape: f32[1,128], index: 6, kind: input, shape index: {}]   ;;  %s2686_s7 = inlined_call_operand.hbm [shape: bf16[128,1024], index: 7, kind: input, shape index: {}]   ;;  %s2687_s8 = inlined_call_operand.hbm [shape: f32[1,1024], index: 8, kind: input, shape index: {}]   ;;  %s2688_s9 = inlined_call_operand.vmem [shape: f32[1,1024], index: 9, kind: input, shape index: {}]   ;;  %s2689_s10 = inlined_call_operand.hbm [shape: f32[2,1,1024], index: 10, kind: output, shape index: {}]  }
   0x1   :  { %2691 = sst [smem:[#allocation24_spill]] %s2680_s1 }
   0x2   :  { %2692 = sst [smem:[#allocation25_spill]] %s2681_s2 }
   0x3   :  { %2693 = sst [smem:[#allocation26_spill]] %s2682_s3 }
   0x4   :  { %2694 = sst [smem:[#allocation27_spill]] %s2683_s4 }
   0x5   :  { %2695 = sst [smem:[#allocation28_spill]] %s2684_s5 }
   0x6   :  { %15 = vsyncpa [#allocation3], 0 }
   0x7   :  { %17 = vsyncpa [#allocation3 + $0x1], 0 }
   0x8   :  { %18 = vsyncpa [#allocation6], 0 }
   0x9   :  { %19 = vsyncpa [#allocation9], 0 }
   0xa   :  { %20 = vsyncpa [#allocation12], 0 }
   0xb   :  { %21 = vsyncpa [#allocation15], 0 }
   0xc   :  { %22 = vsyncpa [#allocation4], 0 }
   0xd   :  { %24 = vsyncpa [#allocation4 + $0x1], 0  ;;  %s2459_s13 = smov 0   ;;  %s2461_s14 = smov 0  }
   0xe   :  { %s2463_s15 = smov 0   ;;  %s2465_s16 = smov 0  }
   0xf   :  { %s2467_s17 = smov 0   ;;  %s2469_s18 = smov 0  }
  0x10 LB: > { %s2690_s19 = sadd.s32 4294967295, %s2390_s18   ;;  %p1500_p0 = scmp.ge.s32.totalorder %s2390_s18, 1  ;;  %s2390_s18 = sphi %s2469_s18, %s30_s18   ;;  %s2386_s17 = sphi %s2467_s17, %s2712_s17   ;;  %s2382_s16 = sphi %s2465_s16, %s2711_s16   ;;  %s2378_s15 = sphi %s2463_s15, %s2710_s15   ;;  %s2374_s14 = sphi %s2461_s14, %s2709_s14   ;;  %s2370_s13 = sphi %s2459_s13, %s2708_s13  }
  0x11   : > { %p2493_p1 = scmp.eq.s32.totalorder %s2690_s19, 0  ;;  %p301_p2 = scmp.lt.s32.totalorder %s2390_s18, 3 }
  0x12   : > { %s2697_s1 = sld [smem:[#allocation24_spill]]  ;;  %p1509_p4 = scmp.ge.s32.totalorder %s2390_s18, 2 }
  0x13   : > { %p2501_p3 = pnand %p1500_p0, %p301_p2  ;;  %s2392_s25 = smov [#allocation5]  }
  0x14   : > { %s315_s26 = sshll.u32 %s2392_s25, 4  ;;  %s2699_s3 = sld [smem:[#allocation26_spill]]  ;;  %s316_s26 = int_to_ptr.vmem [resolvable:$true] %s315_s26 }
  0x15   : > { %p1905_p5 = pneg %p2501_p3  ;;  %s2701_s5 = sld [smem:[#allocation28_spill]] }
  0x16   : > { %s2393_s22 = smov [#allocation8]   ;;  %s386_s19 = sshll.u32 %s2686_s7, 4  ;;  %s387_s19 = int_to_ptr.hbm [resolvable:$true] %s386_s19 }
  0x17   : > { %p2513_p6 = pnand %p1905_p5, %p2493_p1  ;;  %s339_s25 = sshll.u32 %s2393_s22, 4  ;;  %s340_s25 = int_to_ptr.vmem [resolvable:$true] %s339_s25 }
  0x18   : > { %s313_s23 = sshll.u32 %s2697_s1, 4  ;;  %s2394_s1 = smov [#allocation11]   ;;  %s314_s23 = int_to_ptr.hbm [resolvable:$true] %s313_s23 }
  0x19   : > { %1908 = dma.hbm_to_vmem [thread:$0]  (!%p2513_p6), %s314_s23, 32, %s316_s26, [#allocation6]  }
  0x1a   : > { %s337_s29 = sshll.u32 %s2699_s3, 4  ;;  %s365_s3 = sshll.u32 %s2394_s1, 4  ;;  %s338_s29 = int_to_ptr.hbm [resolvable:$true] %s337_s29  ;;  %s366_s3 = int_to_ptr.vmem [resolvable:$true] %s365_s3 }
  0x1b   : > { %s363_s21 = sshll.u32 %s2701_s5, 4  ;;  %s2395_s11 = smov [#allocation14]   ;;  %s364_s21 = int_to_ptr.hbm [resolvable:$true] %s363_s21 }
  0x1c   : > { %1914 = dma.hbm_to_vmem [thread:$0]  (!%p2513_p6), %s338_s29, 16, %s340_s25, [#allocation9]  }
  0x1d   : > { %1920 = dma.hbm_to_vmem [thread:$0]  (!%p2513_p6), %s364_s21, 16, %s366_s3, [#allocation12]  }
  0x1e   : > { %s388_s12 = sshll.u32 %s2395_s11, 4  ;;  %s2396_s22 = smov 512   ;;  %s389_s12 = int_to_ptr.vmem [resolvable:$true] %s388_s12 }
  0x1f   : > { %s2397_s23 = smov 32   ;;  %s2702_s2 = sld [smem:[#allocation25_spill]] }
  0x20   : > { %1926 = dma.hbm_to_vmem [thread:$0]  (!%p2513_p6), %s387_s19, 8192, %s389_s12, [#allocation15], %s2396_s22, %s2396_s22, %s2397_s23  }
  0x21   : > { %s2398_s27 = smov [#allocation7]   ;;  %s2703_s4 = sld [smem:[#allocation27_spill]] }
  0x22   : > { %s327_s1 = sshll.u32 %s2398_s27, 4  ;;  %s2399_s21 = smov [#allocation10]   ;;  %s328_s1 = int_to_ptr.vmem [resolvable:$true] %s327_s1 }
  0x23   : > { %s350_s11 = sshll.u32 %s2399_s21, 4  ;;  %s2400_s19 = smov 64   ;;  %s351_s11 = int_to_ptr.vmem [resolvable:$true] %s350_s11 }
  0x24   : > { %s2401_s12 = smov 4   ;;  %s375_s5 = sshll.u32 %s2685_s6, 4  ;;  %s376_s5 = int_to_ptr.hbm [resolvable:$true] %s375_s5 }
  0x25   : > { %s325_s25 = sshll.u32 %s2702_s2, 4  ;;  %s2402_s26 = smov [#allocation13]   ;;  %s326_s25 = int_to_ptr.hbm [resolvable:$true] %s325_s25 }
  0x26   : > { %1911 = dma.hbm_to_vmem [thread:$0]  (!%p2513_p6), %s326_s25, 16, %s328_s1, [#allocation6]  }
  0x27   : > { %s348_s3 = sshll.u32 %s2703_s4, 4  ;;  %s377_s29 = sshll.u32 %s2402_s26, 4  ;;  %s349_s3 = int_to_ptr.hbm [resolvable:$true] %s348_s3  ;;  %s378_s29 = int_to_ptr.vmem [resolvable:$true] %s377_s29 }
  0x28   : > { %1917 = dma.hbm_to_vmem [thread:$0]  (!%p2513_p6), %s349_s3, 512, %s351_s11, [#allocation9], %s2400_s19, %s2400_s19, %s2401_s12  }
  0x29   : > { %s401_s1 = sshll.u32 %s2687_s8, 4  ;;  %s2403_s28 = smov [#allocation16]   ;;  %s402_s1 = int_to_ptr.hbm [resolvable:$true] %s401_s1 }
  0x2a   : > { %1923 = dma.hbm_to_vmem [thread:$0]  (!%p2513_p6), %s376_s5, 16, %s378_s29, [#allocation12]  }
  0x2b   : > { %s403_s3 = sshll.u32 %s2403_s28, 4  ;;  %s45_s21 = sadd.s32 1, %s2386_s17  ;;  %s404_s3 = int_to_ptr.vmem [resolvable:$true] %s403_s3 }
  0x2c   : > { %1929 = dma.hbm_to_vmem [thread:$0]  (!%p2513_p6), %s402_s1, 128, %s404_s3, [#allocation15]  }
  0x2d   : > { %s1499_s11 = sadd.s32 4294967294, %s2390_s18   ;;  %p47_p7 = scmp.ge.s32.totalorder %s45_s21, 2 }
  0x2e   : > { %s60_s19 = sadd.s32 1, %s2378_s15  ;;  %p67_p8 = scmp.ne.s32.totalorder %s2378_s15, %s2374_s14 }
  0x2f   : > { %s2714_s21 = smov (%p47_p7, %s45_s21), 0  ;;  %p68_p9 = scmp.eq.s32.totalorder %s2390_s18, 0 }
  0x30   : > { %p73_p10 = scmp.ne.s32.totalorder %s2374_s14, %s2370_s13  ;;  %s55_s12 = ssub.s32 %s2386_s17, %s2714_s21 }
  0x31   : > { %s2704_s22 = sadd.s32 4294967295, %s2390_s18   ;;  %p58_p12 = scmp.eq.s32.totalorder %s55_s12, 0 }
  0x32   : > { %p288_p11 = scmp.eq.s32.totalorder %s2704_s22, 1  ;;  %p2567_p13 = por %p2493_p1, %p73_p10 }
  0x33   : > { %p294_p2 = scmp.eq.s32.totalorder %s1499_s11, 1  ;;  %p69_p5 = por %p68_p9, %p67_p8 }
  0x34   : > { %p2571_p0 = por %p288_p11, %p67_p8  ;;  %s417_s29 = sand.u32 1, %s2378_s15  }
  0x35   : > { %s2576_s5 = scalar_select %p58_p12, %s2378_s15, %s60_s19  }
  0x36   : > { %p2578_p6 = por %p294_p2, %p73_p10  ;;  %s1511_s25 = sshll.u32 %s2386_s17, 2 }
  0x37   : > { %p1946_p7 = scmp.lt.s32.totalorder %s2390_s18, 2  ;;  %s1510_s27 = sshll.u32 %s417_s29, 2 }
  0x38   : > { %s427_s3 = scalar_lea.hbm %s2679_s0, %s1511_s25  ;;  %s421_s22 = scalar_lea.vmem [#allocation2], %s1510_s27 }
  0x39   : > { %s429_s12 = sshll.u32 %s427_s3, 4  ;;  %s431_s2 = sshll.u32 %s421_s22, 4  ;;  %s430_s12 = int_to_ptr.hbm [resolvable:$true] %s429_s12  ;;  %s432_s2 = int_to_ptr.vmem [resolvable:$true] %s431_s2 }
  0x3a   : > { %p1931_p11 = pnand %p1946_p7, %p69_p5  ;;  %s418_s11 = scalar_lea.sflag [#allocation3], %s417_s29 }
  0x3b   : > { %440 = sbr.rel (%p2501_p3) target bundleno = 719 (0x2cf), region = 60  ;;  %s2591_s19 = sand.u32 (!%p2501_p3), 1, %s2374_s14  }
  0x3c   : > { %1933 = dma.hbm_to_vmem [thread:$0]  (!%p1931_p11), %s430_s12, 64, %s432_s2, %s418_s11  }
  0x3d   : > { %s1513_s4 = sshll.u32 (!%p2501_p3), %s2591_s19, 2  ;;  %s443_s1 = scalar_lea.sflag (!%p2501_p3), [#allocation3], %s2591_s19 }
  0x3e   : > { %s446_s25 = scalar_lea.vmem (!%p2501_p3), [#allocation2], %s1513_s4 }
  0x40   : > { %2345 = dma.done.wait (%p2567_p13), %s443_s1, 64  }
  0x41   : > { %2347 = vsyncadd (%p2567_p13), %s443_s1, 4294967232 }
  0x42   : > { %2349 = dma.done.wait (%p2493_p1), [#allocation6], 48  }
  0x43   : > { %2351 = vsyncadd (%p2493_p1), [#allocation6], 4294967248 }
  0x44   : > { %2353 = dma.done.wait (%p2493_p1), [#allocation9], 528  }
  0x45   : > { %2355 = vsyncadd (%p2493_p1), [#allocation9], 4294966768 }
  0x46   : > { %2357 = dma.done.wait (%p2493_p1), [#allocation12], 32  }
  0x47   : > { %2359 = vsyncadd (%p2493_p1), [#allocation12], 4294967264 }
  0x48   : > { %2361 = dma.done.wait (%p2493_p1), [#allocation15], 8320  }
  0x49   : > { %2363 = vsyncadd (%p2493_p1), [#allocation15], 4294958976  ;;  %vm550_vm0 = vcmask 1041408   ;;  %v527_v0 = vld [vmem:[%s446_s25] sm:$0xf]  ;;  %vm546_vm1 = vcmask 31744  }
  0x4a   : > { %v529_v1 = vld [vmem:[#allocation5] sm:$0x3]  ;;  %v528_v2 = vpack.c.bf16 %v527_v0, %v527_v0  ;;  %v1803_v6 = vld [vmem:[#allocation10 + $0x10] sm:$0xff]  ;;  %v1802_v7 = vld [vmem:[#allocation10 + $0x8] sm:$0xff]  ;;  %vm615_vm2 = vcmask 523264   ;;  %s1522_s20 = sshll.u32 %s2591_s19, 3 }
  0x4b   : > { %v552_v3 = vsel %vm550_vm0, %v529_v1, 0  ;;  %v1804_v5 = vld [vmem:[#allocation10 + $0x18] sm:$0xff]  ;;  %v1801_v8 = vld [vmem:[#allocation10] sm:$0xff]  ;;  %v1861_v11 = vld [vmem:[#allocation14 + $0x1c4] sm:$0xf]  ;;  %s1798_s24 = sshll.u32 %s2382_s16, 3 }
  0x4c   : > { %561 = vmatpush.bf16.msra.mxu0 %v552_v3  ;;  %530 = vxpose.xlu0.c.b16.start.end [1/1] (short) (narrow) %v528_v2, 16  ;;  %v1767_v9 = vld [vmem:[#allocation14 + $0x1c0] sm:$0xf]  ;;  %v1769_v13 = vld [vmem:[#allocation14 + $0x1e0] sm:$0xf0]  ;;  %vm1305_vm3 = vcmask 1040384   ;;  %s1333_s27 = scalar_lea.hbm %s2689_s10, %s1798_s24 }
  0x4d   : > { %623 = vmatpush.bf16.msra.mxu1 %v1804_v5  ;;  %v1865_v10 = vld [vmem:[#allocation14 + $0x1dc] sm:$0xf0]  ;;  %v1775_v14 = vld [vmem:[#allocation14 + $0x1c8] sm:$0xf]  ;;  %v1772_v16 = vor.u32 %v1861_v11, %v1769_v13  ;;  %v1862_v18 = vld [vmem:[#allocation14 + $0x1cc] sm:$0xf] }
  0x4e   : > { %v1768_v12 = vor.u32 %v1865_v10, %v1767_v9  ;;  %v1866_v15 = vld [vmem:[#allocation14 + $0x1e4] sm:$0xf0]  ;;  %v1777_v19 = vld [vmem:[#allocation14 + $0x1e8] sm:$0xf0]  ;;  %v1735_v20 = vld [vmem:[#allocation14 + $0x180] sm:$0xf] }
  0x4f   : > { %v1776_v17 = vor.u32 %v1866_v15, %v1775_v14  ;;  %v1780_v21 = vor.u32 %v1862_v18, %v1777_v19  ;;  %v1857_v22 = vld [vmem:[#allocation14 + $0x19c] sm:$0xf0]  ;;  %v1853_v23 = vld [vmem:[#allocation14 + $0x184] sm:$0xf]  ;;  %1046 = vmatpush.bf16.msra.mxu3 %v1772_v16  ;;  %v1743_v27 = vld [vmem:[#allocation14 + $0x188] sm:$0xf] }
  0x50   : > { %1032 = vmatpush.bf16.msra.mxu2 %v1768_v12  ;;  %v1737_v24 = vld [vmem:[#allocation14 + $0x1a0] sm:$0xf0]  ;;  %v1736_v25 = vor.u32 %v1857_v22, %v1735_v20  ;;  %v1858_v28 = vld [vmem:[#allocation14 + $0x1a4] sm:$0xf0]  ;;  %v1854_v29 = vld [vmem:[#allocation14 + $0x18c] sm:$0xf] }
  0x51   : > { %624 = vmatpush.bf16.msra.mxu1 %v1803_v6  ;;  %1060 = vmatpush.bf16.msrb.mxu0 %v1776_v17  ;;  %v1740_v26 = vor.u32 %v1853_v23, %v1737_v24  ;;  %v1744_v30 = vor.u32 %v1858_v28, %v1743_v27  ;;  %v1745_v31 = vld [vmem:[#allocation14 + $0x1a8] sm:$0xf0]  ;;  %v1703_v32 = vld [vmem:[#allocation14 + $0x140] sm:$0xf]  ;;  %v1845_v35 = vld [vmem:[#allocation14 + $0x144] sm:$0xf] }
  0x52   : > { %v1849_v33 = vld [vmem:[#allocation14 + $0x15c] sm:$0xf0]  ;;  %v1748_v34 = vor.u32 %v1854_v29, %v1745_v31  ;;  %v1705_v36 = vld [vmem:[#allocation14 + $0x160] sm:$0xf0]  ;;  %v1711_v37 = vld [vmem:[#allocation14 + $0x148] sm:$0xf] }
  0x53   : > { %v1704_v38 = vor.u32 %v1849_v33, %v1703_v32  ;;  %v1850_v39 = vld [vmem:[#allocation14 + $0x164] sm:$0xf0]  ;;  %v1846_v40 = vld [vmem:[#allocation14 + $0x14c] sm:$0xf]  ;;  %1047 = vmatpush.bf16.msra.mxu3 %v1740_v26  ;;  %v1708_v42 = vor.u32 %v1845_v35, %v1705_v36  ;;  %v1671_v44 = vld [vmem:[#allocation14 + $0x100] sm:$0xf] }
  0x54   : > { %1033 = vmatpush.bf16.msra.mxu2 %v1736_v25  ;;  %v1713_v41 = vld [vmem:[#allocation14 + $0x168] sm:$0xf0]  ;;  %v1712_v43 = vor.u32 %v1850_v39, %v1711_v37  ;;  %v1841_v45 = vld [vmem:[#allocation14 + $0x11c] sm:$0xf0]  ;;  %v1837_v46 = vld [vmem:[#allocation14 + $0x104] sm:$0xf] }
  0x55   : > { %625 = vmatpush.bf16.msra.mxu1 %v1802_v7  ;;  %1061 = vmatpush.bf16.msrb.mxu0 %v1744_v30  ;;  %v1716_v47 = vor.u32 %v1846_v40, %v1713_v41  ;;  %v1673_v48 = vld [vmem:[#allocation14 + $0x120] sm:$0xf0]  ;;  %v1679_v49 = vld [vmem:[#allocation14 + $0x108] sm:$0xf]  ;;  %v1838_v51 = vld [vmem:[#allocation14 + $0x10c] sm:$0xf]  ;;  %v1672_v53 = vor.u32 %v1841_v45, %v1671_v44 }
  0x56   : > { %v1842_v50 = vld [vmem:[#allocation14 + $0x124] sm:$0xf0]  ;;  %v1681_v52 = vld [vmem:[#allocation14 + $0x128] sm:$0xf0]  ;;  %v1676_v54 = vor.u32 %v1837_v46, %v1673_v48  ;;  %v1639_v56 = vld [vmem:[#allocation14 + $0xc0] sm:$0xf] }
  0x57   : > { %1048 = vmatpush.bf16.msra.mxu3 %v1708_v42  ;;  %v1680_v55 = vor.u32 %v1842_v50, %v1679_v49  ;;  %v1833_v57 = vld [vmem:[#allocation14 + $0xdc] sm:$0xf0]  ;;  %v1829_v58 = vld [vmem:[#allocation14 + $0xc4] sm:$0xf]  ;;  %v1684_v59 = vor.u32 %v1838_v51, %v1681_v52  ;;  %v1647_v61 = vld [vmem:[#allocation14 + $0xc8] sm:$0xf] }
  0x58   : > { %1034 = vmatpush.bf16.msra.mxu2 %v1704_v38  ;;  %v1641_v60 = vld [vmem:[#allocation14 + $0xe0] sm:$0xf0]  ;;  %v1834_v62 = vld [vmem:[#allocation14 + $0xe4] sm:$0xf0]  ;;  %v1830_v63 = vld [vmem:[#allocation14 + $0xcc] sm:$0xf]  ;;  %v1640_v3 = vor.u32 %v1833_v57, %v1639_v56 }
  0x59   : > { %626 = vmatpush.bf16.msra.mxu1 %v1801_v8  ;;  %1062 = vmatpush.bf16.msrb.mxu0 %v1712_v43  ;;  %v1649_v0 = vld [vmem:[#allocation14 + $0xe8] sm:$0xf0]  ;;  %v2018_v2 = vld [vmem:[#allocation7] ss:$0 sm:$0xff]  ;;  %v1648_v5 = vor.u32 %v1834_v62, %v1647_v61  ;;  %v1607_v6 = vld [vmem:[#allocation14 + $0x80] sm:$0xf] }
  0x5a   : > { %v1825_v7 = vld [vmem:[#allocation14 + $0x9c] sm:$0xf0]  ;;  %v1821_v8 = vld [vmem:[#allocation14 + $0x84] sm:$0xf]  ;;  %v1652_v9 = vor.u32 %v1830_v63, %v1649_v0  ;;  %v1615_v11 = vld [vmem:[#allocation14 + $0x88] sm:$0xf] }
  0x5b   : > { %1049 = vmatpush.bf16.msra.mxu3 %v1676_v54  ;;  %v1609_v10 = vld [vmem:[#allocation14 + $0xa0] sm:$0xf0]  ;;  %v1826_v12 = vld [vmem:[#allocation14 + $0xa4] sm:$0xf0]  ;;  %v1822_v13 = vld [vmem:[#allocation14 + $0x8c] sm:$0xf]  ;;  %v1608_v17 = vor.u32 %v1825_v7, %v1607_v6 }
  0x5c   : > { %1035 = vmatpush.bf16.msra.mxu2 %v1672_v53  ;;  %v1617_v14 = vld [vmem:[#allocation14 + $0xa8] sm:$0xf0]  ;;  %v2019_v16 = vld [vmem:[#allocation8] ss:$0 sm:$0xff]  ;;  %v1612_v18 = vor.u32 %v1821_v8, %v1609_v10  ;;  %v1616_v19 = vor.u32 %v1826_v12, %v1615_v11  ;;  %v1575_v20 = vld [vmem:[#allocation14 + $0x40] sm:$0xf] }
  0x5d   : > { %1074 = vmatpush.bf16.msrb.mxu1 %v1780_v21  ;;  %1063 = vmatpush.bf16.msrb.mxu0 %v1680_v55  ;;  %v1817_v21 = vld [vmem:[#allocation14 + $0x5c] sm:$0xf0]  ;;  %v1813_v22 = vld [vmem:[#allocation14 + $0x44] sm:$0xf]  ;;  %v1620_v23 = vor.u32 %v1822_v13, %v1617_v14  ;;  %v1583_v25 = vld [vmem:[#allocation14 + $0x48] sm:$0xf] }
  0x5e   : > { %v1577_v24 = vld [vmem:[#allocation14 + $0x60] sm:$0xf0]  ;;  %v1818_v26 = vld [vmem:[#allocation14 + $0x64] sm:$0xf0]  ;;  %v1814_v27 = vld [vmem:[#allocation14 + $0x4c] sm:$0xf]  ;;  %v1576_v31 = vor.u32 %v1817_v21, %v1575_v20 }
  0x5f   : > { %v1585_v28 = vld [vmem:[#allocation14 + $0x68] sm:$0xf0]  ;;  %v1580_v33 = vor.u32 %v1813_v22, %v1577_v24  ;;  %v1543_v40 = vld [vmem:[#allocation14] sm:$0xf]  ;;  %v1805_v42 = vld [vmem:[#allocation14 + $0x4] sm:$0xf] }
  0x60   : > { %1036 = vmatpush.bf16.msra.mxu2 %v1640_v3  ;;  %v1588_v35 = vor.u32 %v1814_v27, %v1585_v28  ;;  %v1809_v41 = vld [vmem:[#allocation14 + $0x1c] sm:$0xf0]  ;;  %v1545_v44 = vld [vmem:[#allocation14 + $0x20] sm:$0xf0]  ;;  %v1551_v45 = vld [vmem:[#allocation14 + $0x8] sm:$0xf] }
  0x61   : > { %1075 = vmatpush.bf16.msrb.mxu1 %v1748_v34  ;;  %1064 = vmatpush.bf16.msrb.mxu0 %v1648_v5  ;;  %v1584_v34 = vor.u32 %v1818_v26, %v1583_v25  ;;  %v1544_v43 = vor.u32 %v1809_v41, %v1543_v40  ;;  %v1548_v46 = vor.u32 %v1805_v42, %v1545_v44  ;;  %v1806_v48 = vld [vmem:[#allocation14 + $0xc] sm:$0xf]  ;;  %v1783_v52 = vld [vmem:[#allocation14 + $0x1d0] sm:$0xf]  ;;  %v1863_v55 = vld [vmem:[#allocation14 + $0x1d4] sm:$0xf] }
  0x62   : > { %v1553_v49 = vld [vmem:[#allocation14 + $0x28] sm:$0xf0]  ;;  %v1867_v53 = vld [vmem:[#allocation14 + $0x1ec] sm:$0xf0]  ;;  %v1785_v56 = vld [vmem:[#allocation14 + $0x1f0] sm:$0xf0] }
  0x63   : > { %v1556_v51 = vor.u32 %v1806_v48, %v1553_v49  ;;  %v1784_v54 = vor.u32 %v1867_v53, %v1783_v52  ;;  %v1791_v57 = vld [vmem:[#allocation14 + $0x1d8] sm:$0xf]  ;;  %v1793_v61 = vld [vmem:[#allocation14 + $0x1f8] sm:$0xf0]  ;;  %v1751_v0 = vld [vmem:[#allocation14 + $0x190] sm:$0xf] }
  0x64   : > { %1037 = vmatpush.bf16.msra.mxu2 %v1608_v17  ;;  %v1759_v5 = vld [vmem:[#allocation14 + $0x198] sm:$0xf]  ;;  %v1761_v10 = vld [vmem:[#allocation14 + $0x1b8] sm:$0xf0]  ;;  %v1719_v12 = vld [vmem:[#allocation14 + $0x150] sm:$0xf] }
  0x65   : > { %1076 = vmatpush.bf16.msrb.mxu1 %v1716_v47  ;;  %1065 = vmatpush.bf16.msrb.mxu0 %v1616_v19  ;;  %v1810_v47 = vld [vmem:[#allocation14 + $0x24] sm:$0xf0]  ;;  %v1860_v6 = vld [vmem:[#allocation14 + $0x1b4] sm:$0xf0]  ;;  %v1851_v13 = vld [vmem:[#allocation14 + $0x16c] sm:$0xf0] }
  0x66   : > { %v1552_v50 = vor.u32 %v1810_v47, %v1551_v45  ;;  %v1760_v8 = vor.u32 %v1860_v6, %v1759_v5  ;;  %v1847_v14 = vld [vmem:[#allocation14 + $0x154] sm:$0xf]  ;;  %v1727_v17 = vld [vmem:[#allocation14 + $0x158] sm:$0xf]  ;;  %v1848_v20 = vld [vmem:[#allocation14 + $0x15c] sm:$0xf] }
  0x67   : > { %v1729_v21 = vld [vmem:[#allocation14 + $0x178] sm:$0xf0]  ;;  %v1687_v24 = vld [vmem:[#allocation14 + $0x110] sm:$0xf]  ;;  %v1839_v26 = vld [vmem:[#allocation14 + $0x114] sm:$0xf] }
  0x68   : > { %1038 = vmatpush.bf16.msra.mxu2 %v1576_v31  ;;  %v1843_v25 = vld [vmem:[#allocation14 + $0x12c] sm:$0xf0]  ;;  %v1689_v28 = vld [vmem:[#allocation14 + $0x130] sm:$0xf0]  ;;  %v1663_v41 = vld [vmem:[#allocation14 + $0xd8] sm:$0xf] }
  0x69   : > { %1077 = vmatpush.bf16.msrb.mxu1 %v1684_v59  ;;  %1066 = vmatpush.bf16.msrb.mxu0 %v1584_v34  ;;  %v1868_v59 = vld [vmem:[#allocation14 + $0x1f4] sm:$0xf0]  ;;  %v1688_v27 = vor.u32 %v1843_v25, %v1687_v24  ;;  %v1692_v31 = vor.u32 %v1839_v26, %v1689_v28  ;;  %v1657_v40 = vld [vmem:[#allocation14 + $0xf0] sm:$0xf0]  ;;  %v1832_v45 = vld [vmem:[#allocation14 + $0xdc] sm:$0xf] }
  0x6a   : > { %v1792_v62 = vor.u32 %v1868_v59, %v1791_v57  ;;  %v1836_v42 = vld [vmem:[#allocation14 + $0xf4] sm:$0xf0]  ;;  %v1623_v47 = vld [vmem:[#allocation14 + $0x90] sm:$0xf]  ;;  %v1633_v57 = vld [vmem:[#allocation14 + $0xb8] sm:$0xf0] }
  0x6b   : > { %v1664_v44 = vor.u32 %v1836_v42, %v1663_v41  ;;  %v1827_v49 = vld [vmem:[#allocation14 + $0xac] sm:$0xf0]  ;;  %v1631_v53 = vld [vmem:[#allocation14 + $0x98] sm:$0xf]  ;;  %vm1307_vm4 = vcmask 1042434   ;;  %vm1312_vm5 = vcmask 1046534  }
  0x6c   : > { %1039 = vmatpush.bf16.msra.mxu2 %v1544_v43  ;;  %v1624_v52 = vor.u32 %v1827_v49, %v1623_v47  ;;  %v1819_v59 = vld [vmem:[#allocation14 + $0x6c] sm:$0xf0]  ;;  %vm1310_vm6 = vcmask 1044484   ;;  %vm1314_vm7 = vcmask 1045508   ;;  %vm1316_vm8 = vcmask 1043456   ;;  %s523_s16 = scalar_lea.vmem [#allocation17], %s1522_s20 }
  0x6d   : > { %1078 = vmatpush.bf16.msrb.mxu1 %v1652_v9  ;;  %1067 = vmatpush.bf16.msrb.mxu0 %v1552_v50  ;;  %v1856_v9 = vld [vmem:[#allocation14 + $0x19c] sm:$0xf]  ;;  %v1823_v50 = vld [vmem:[#allocation14 + $0x94] sm:$0xf]  ;;  %v1559_v6 = vld [vmem:[#allocation14 + $0x10] sm:$0xf] }
  0x6e   : > { %v1764_v11 = vor.u32 %v1856_v9, %v1761_v10  ;;  %v1807_v10 = vld [vmem:[#allocation14 + $0x14] sm:$0xf]  ;;  %s1335_s28 = sshll.u32 %s523_s16, 4  ;;  %s1337_s3 = sshll.u32 %s1333_s27, 4  ;;  %s1336_s28 = int_to_ptr.vmem [resolvable:$true] %s1335_s28  ;;  %s1338_s3 = int_to_ptr.hbm [resolvable:$true] %s1337_s3 }
  0x6f   : > { %s1322_s12 = scalar_lea.sflag [#allocation4], %s2591_s19  ;;  %s2306_s22 = sshra.s32 %s1338_s3, 4  ;;  %s2307_s22 = int_to_ptr.hbm [resolvable:$true] %s2306_s22 }
  0x70   : > { %1088 = vmatpush.bf16.msrb.mxu2 %v1784_v54  ;;  %v1828_v54 = vld [vmem:[#allocation14 + $0xb4] sm:$0xf0]  ;;  %s2308_s11 = scalar_lea.hbm %s2307_s22, 8  ;;  %s2312_s2 = scalar_lea.hbm %s2689_s10, 16 }
  0x71   : > { %1079 = vmatpush.bf16.msrb.mxu1 %v1620_v23  ;;  %v1732_v23 = vor.u32 %v1848_v20, %v1729_v21  ;;  %v2020_v21 = vld [vmem:[#allocation11] ss:$0 sm:$0xff]  ;;  %p2309_p1 = scmp.ne.s32.totalorder %s2307_s22, %s2308_s11  ;;  %p2313_p9 = scmp.lt.s32.totalorder %s2307_s22, %s2689_s10 }
  0x72   : > { %p2314_p10 = scmp.lt.s32.totalorder %s2312_s2, %s2308_s11 }
  0x73   : > { %p2310_p3 = pnand %p2309_p1, %p2571_p0 }
  0x74   : > { %p2315_p12 = por %p2314_p10, %p2313_p9 }
  0x75   : > { %1080 = vmatpush.bf16.msrb.mxu1 %v1588_v35  ;;  %p2311_p8 = pneg %p2310_p3 }
  0x77   : > { %p2316_p13 = pnand %p2315_p12, %p2311_p8 }
  0x79   : > { %1081 = vmatpush.bf16.msrb.mxu1 %v1556_v51  ;;  %v1625_v51 = vld [vmem:[#allocation14 + $0xb0] sm:$0xf0] }
  0xf8   : > { %v538_v4 = vpop.trf.xlu0 }
  0xf9   : > { %1523 = vmatmul.msk.bf16.vlgmr.msra.gmra.mxu0 %vm546_vm1, %v538_v4  ;;  %v1644_v4 = vor.u32 %v1829_v58, %v1641_v60  ;;  %v1788_v58 = vor.u32 %v1863_v55, %v1785_v56  ;;  %v1864_v60 = vld [vmem:[#allocation14 + $0x1dc] sm:$0xf]  ;;  %v1628_v56 = vor.u32 %v1823_v50, %v1625_v51 }
  0xfa   : > { %v1796_v63 = vor.u32 %v1864_v60, %v1793_v61  ;;  %1116 = vmatpush.bf16.msra.mxu0 %v1792_v62  ;;  %v1824_v55 = vld [vmem:[#allocation14 + $0x9c] sm:$0xf]  ;;  %v1632_v60 = vor.u32 %v1828_v54, %v1631_v53  ;;  %v1815_v62 = vld [vmem:[#allocation14 + $0x54] sm:$0xf] }
  0xfb   : > { %1050 = vmatpush.bf16.msra.mxu3 %v1644_v4  ;;  %v1753_v4 = vld [vmem:[#allocation14 + $0x1b0] sm:$0xf0]  ;;  %v1636_v61 = vor.u32 %v1824_v55, %v1633_v57 }
  0xfe   : > { %1117 = vmatpush.bf16.msra.mxu0 %v1760_v8 }
  0xff   : > { %1051 = vmatpush.bf16.msra.mxu3 %v1612_v18  ;;  %v1852_v18 = vld [vmem:[#allocation14 + $0x174] sm:$0xf0] }
 0x100   : > { %v1728_v22 = vor.u32 %v1852_v18, %v1727_v17 }
 0x102   : > { %1118 = vmatpush.bf16.msra.mxu0 %v1728_v22 }
 0x103   : > { %1052 = vmatpush.bf16.msra.mxu3 %v1580_v33  ;;  %v1697_v33 = vld [vmem:[#allocation14 + $0x138] sm:$0xf0] }
 0x107   : > { %1053 = vmatpush.bf16.msra.mxu3 %v1548_v46  ;;  %v1665_v46 = vld [vmem:[#allocation14 + $0xf8] sm:$0xf0] }
 0x108   : > { %v1668_v48 = vor.u32 %v1832_v45, %v1665_v46 }
 0x10b   : > { %1102 = vmatpush.bf16.msrb.mxu3 %v1788_v58  ;;  %v1591_v58 = vld [vmem:[#allocation14 + $0x50] sm:$0xf] }
 0x176   : > { %v563_v1 = vpop.f32.mrf.mxu0 }
 0x177   : > { %v572_v15 = vmul.f32 %v2018_v2, %v563_v1  ;;  %v1859_v1 = vld [vmem:[#allocation14 + $0x1ac] sm:$0xf0] }
 0x178   : > { %v1752_v3 = vor.u32 %v1859_v1, %v1751_v0  ;;  %v1599_v0 = vld [vmem:[#allocation14 + $0x58] sm:$0xf] }
 0x179   : > { %v578_v29 = vadd.f32 %v2019_v16, %v572_v15  ;;  %v1720_v15 = vor.u32 %v1851_v13, %v1719_v12  ;;  %v1820_v1 = vld [vmem:[#allocation14 + $0x74] sm:$0xf0] }
 0x17a   : > { %1089 = vmatpush.bf16.msrb.mxu2 %v1752_v3  ;;  %v1601_v3 = vld [vmem:[#allocation14 + $0x78] sm:$0xf0]  ;;  %v1600_v8 = vor.u32 %v1820_v1, %v1599_v0  ;;  %v1567_v12 = vld [vmem:[#allocation14 + $0x18] sm:$0xf] }
 0x17b   : > { %v580_v37 = vmax.f32 %v578_v29, 0.0  ;;  %v1695_v29 = vld [vmem:[#allocation14 + $0x118] sm:$0xf] }
 0x17c   : > { %v1812_v13 = vld [vmem:[#allocation14 + $0x34] sm:$0xf0] }
 0x17d   : > { %v1568_v18 = vor.u32 %v1812_v13, %v1567_v12 }
 0x17e   : > { %v565_v30 = vpop.f32.mrf.mxu0  ;;  %1090 = vmatpush.bf16.msrb.mxu2 %v1720_v15  ;;  %v1569_v15 = vld [vmem:[#allocation14 + $0x38] sm:$0xf0] }
 0x17f   : > { %v573_v32 = vmul.f32 %v2018_v2, %v565_v30  ;;  %v1855_v2 = vld [vmem:[#allocation14 + $0x194] sm:$0xf]  ;;  %v1844_v30 = vld [vmem:[#allocation14 + $0x134] sm:$0xf0] }
 0x180   : > { %v1756_v7 = vor.u32 %v1855_v2, %v1753_v4  ;;  %v1696_v34 = vor.u32 %v1844_v30, %v1695_v29  ;;  %v1816_v2 = vld [vmem:[#allocation14 + $0x5c] sm:$0xf]  ;;  %v1592_v4 = vor.u32 %v1819_v59, %v1591_v58 }
 0x181   : > { %v579_v36 = vadd.f32 %v2019_v16, %v573_v32  ;;  %v1721_v16 = vld [vmem:[#allocation14 + $0x170] sm:$0xf0]  ;;  %v1840_v32 = vld [vmem:[#allocation14 + $0x11c] sm:$0xf]  ;;  %v1604_v9 = vor.u32 %v1816_v2, %v1601_v3 }
 0x182   : > { %1103 = vmatpush.bf16.msrb.mxu3 %v1756_v7  ;;  %v1724_v19 = vor.u32 %v1847_v14, %v1721_v16  ;;  %v1700_v35 = vor.u32 %v1840_v32, %v1697_v33  ;;  %1091 = vmatpush.bf16.msrb.mxu2 %v1688_v27  ;;  %v1811_v7 = vld [vmem:[#allocation14 + $0x2c] sm:$0xf0]  ;;  %v1808_v14 = vld [vmem:[#allocation14 + $0x1c] sm:$0xf] }
 0x183   : > { %v581_v38 = vmax.f32 %v579_v36, 0.0  ;;  %v1655_v36 = vld [vmem:[#allocation14 + $0xd0] sm:$0xf]  ;;  %1119 = vmatpush.bf16.msra.mxu0 %v1696_v34  ;;  %v1560_v16 = vor.u32 %v1811_v7, %v1559_v6 }
 0x185   : > { %v582_v39 = vpack.c.bf16 %v581_v38, %v580_v37  ;;  %v1835_v37 = vld [vmem:[#allocation14 + $0xec] sm:$0xf0]  ;;  %v1831_v38 = vld [vmem:[#allocation14 + $0xd4] sm:$0xf] }
 0x186   : > { %1104 = vmatpush.bf16.msrb.mxu3 %v1724_v19  ;;  %v1660_v43 = vor.u32 %v1831_v38, %v1657_v40  ;;  %v1572_v19 = vor.u32 %v1808_v14, %v1569_v15 }
 0x187   : > { %1540 = vmatmul.msk.bf16.vlgmr.msra.gmra.mxu1 %vm615_vm2, %v582_v39  ;;  %v1656_v39 = vor.u32 %v1835_v37, %v1655_v36  ;;  %1120 = vmatpush.bf16.msra.mxu0 %v1664_v44 }
 0x188   : > { %1130 = vmatpush.bf16.msra.mxu1 %v1796_v63  ;;  %v1593_v63 = vld [vmem:[#allocation14 + $0x70] sm:$0xf0] }
 0x189   : > { %1092 = vmatpush.bf16.msrb.mxu2 %v1656_v39  ;;  %v1596_v5 = vor.u32 %v1815_v62, %v1593_v63 }
 0x18a   : > { %1105 = vmatpush.bf16.msrb.mxu3 %v1692_v31  ;;  %v2616_v31 = vld [vmem:[#allocation16] sm:$0xff] }
 0x18b   : > { %1121 = vmatpush.bf16.msra.mxu0 %v1632_v60  ;;  %v1148_v34 = vperm.slane %v2616_v31, 2  ;;  %v1149_v36 = vperm.slane %v2616_v31, 3  ;;  %v1147_v41 = vperm.slane %v2616_v31, 1  ;;  %v1146_v46 = vperm.slane %v2616_v31, 0 }
 0x18c   : > { %1131 = vmatpush.bf16.msra.mxu1 %v1764_v11  ;;  %v1561_v11 = vld [vmem:[#allocation14 + $0x30] sm:$0xf0] }
 0x18d   : > { %1093 = vmatpush.bf16.msrb.mxu2 %v1624_v52  ;;  %v1564_v17 = vor.u32 %v1807_v10, %v1561_v11 }
 0x18e   : > { %1106 = vmatpush.bf16.msrb.mxu3 %v1660_v43 }
 0x18f   : > { %1122 = vmatpush.bf16.msra.mxu0 %v1600_v8 }
 0x190   : > { %1132 = vmatpush.bf16.msra.mxu1 %v1732_v23  ;;  %v2021_v23 = vld [vmem:[#allocation13] ss:$0 sm:$0xff] }
 0x191   : > { %1094 = vmatpush.bf16.msrb.mxu2 %v1592_v4 }
 0x192   : > { %1107 = vmatpush.bf16.msrb.mxu3 %v1628_v56 }
 0x193   : > { %1123 = vmatpush.bf16.msra.mxu0 %v1568_v18 }
 0x194   : > { %1133 = vmatpush.bf16.msra.mxu1 %v1700_v35  ;;  %v2622_v35 = vld [vmem:[%s2688_s9] sm:$0xff] }
 0x195   : > { %1095 = vmatpush.bf16.msrb.mxu2 %v1560_v16  ;;  %v1182_v40 = vperm.slane %v2622_v35, 2  ;;  %v1183_v42 = vperm.slane %v2622_v35, 3  ;;  %v1181_v51 = vperm.slane %v2622_v35, 1  ;;  %v1180_v56 = vperm.slane %v2622_v35, 0 }
 0x196   : > { %1108 = vmatpush.bf16.msrb.mxu3 %v1596_v5  ;;  %v1152_v5 = vperm.slane %v2616_v31, 6 }
 0x198   : > { %1134 = vmatpush.bf16.msra.mxu1 %v1668_v48 }
 0x19a   : > { %1109 = vmatpush.bf16.msrb.mxu3 %v1564_v17  ;;  %v1186_v17 = vperm.slane %v2622_v35, 6 }
 0x19c   : > { %1135 = vmatpush.bf16.msra.mxu1 %v1636_v61 }
 0x1a0   : > { %1136 = vmatpush.bf16.msra.mxu1 %v1604_v9  ;;  %v1153_v9 = vperm.slane %v2616_v31, 7 }
 0x1a4   : > { %1137 = vmatpush.bf16.msra.mxu1 %v1572_v19 }
 0x204   : > { %v628_v20 = vpop.f32.mrf.mxu1 }
 0x205   : > { %v637_v22 = vmul.f32 %v2020_v21, %v628_v20  ;;  %v1187_v20 = vperm.slane %v2622_v35, 7 }
 0x207   : > { %v643_v25 = vadd.f32 %v2021_v23, %v637_v22  ;;  %v1150_v22 = vperm.slane %v2616_v31, 4 }
 0x209   : > { %v645_v28 = vmax.f32 %v643_v25, 0.0  ;;  %v1151_v25 = vperm.slane %v2616_v31, 5 }
 0x20c   : > { %v630_v24 = vpop.f32.mrf.mxu1 }
 0x20d   : > { %v638_v26 = vmul.f32 %v2020_v21, %v630_v24 }
 0x20f   : > { %v644_v27 = vadd.f32 %v2021_v23, %v638_v26 }
 0x211   : > { %v646_v29 = vmax.f32 %v644_v27, 0.0 }
 0x213   : > { %v647_v30 = vpack.c.bf16 %v646_v29, %v645_v28 }
 0x215   : > { %1040 = vmatmul.bf16.vlgmr.msra.gmra.mxu2 %v647_v30  ;;  %1054 = vmatmul.bf16.vlgmr.msra.gmra.mxu3 %v647_v30 }
 0x216   : > { %1068 = vmatmul.bf16.vlgmr.msrb.gmra.mxu0 %v647_v30  ;;  %1082 = vmatmul.bf16.vlgmr.msrb.gmra.mxu1 %v647_v30 }
 0x225   : > { %1096 = vmatmul.bf16.vlgmr.msrb.gmra.mxu2 %v647_v30  ;;  %1110 = vmatmul.bf16.vlgmr.msrb.gmra.mxu3 %v647_v30 }
 0x226   : > { %1124 = vmatmul.bf16.vlgmr.msra.gmra.mxu0 %v647_v30  ;;  %1138 = vmatmul.bf16.vlgmr.msra.gmra.mxu1 %v647_v30  ;;  %v1184_v30 = vperm.slane %v2622_v35, 4 }
 0x293   : > { %v1069_v32 = vpop.f32.mrf.mxu0  ;;  %v1083_v33 = vpop.f32.mrf.mxu1 }
 0x294   : > { %v1164_v39 = vmul.f32 %v1148_v34, %v1069_v32  ;;  %v1165_v45 = vmul.f32 %v1149_v36, %v1083_v33 }
 0x296   : > { %v1198_v49 = vadd.f32 %v1182_v40, %v1164_v39  ;;  %v1199_v54 = vadd.f32 %v1183_v42, %v1165_v45 }
 0x298   : > { %v1041_v37 = vpop.f32.mrf.mxu2  ;;  %v1055_v38 = vpop.f32.mrf.mxu3  ;;  %v1214_v60 = vmax.f32 %v1198_v49, 0.0  ;;  %v1215_v7 = vmax.f32 %v1199_v54, 0.0 }
 0x299   : > { %v1163_v50 = vmul.f32 %v1147_v41, %v1055_v38  ;;  %v1162_v55 = vmul.f32 %v1146_v46, %v1041_v37 }
 0x29b   : > { %v1071_v43 = vpop.f32.mrf.mxu0  ;;  %v1085_v44 = vpop.f32.mrf.mxu1  ;;  %v1197_v61 = vadd.f32 %v1181_v51, %v1163_v50  ;;  %v1196_v8 = vadd.f32 %v1180_v56, %v1162_v55 }
 0x29c   : > { %v1172_v47 = vmul.f32 %v1148_v34, %v1071_v43  ;;  %v1173_v48 = vmul.f32 %v1149_v36, %v1085_v44 }
 0x29d   : > { %v1213_v10 = vmax.f32 %v1197_v61, 0.0  ;;  %v1212_v18 = vmax.f32 %v1196_v8, 0.0 }
 0x29e   : > { %v1206_v52 = vadd.f32 %v1182_v40, %v1172_v47  ;;  %v1207_v53 = vadd.f32 %v1183_v42, %v1173_v48 }
 0x2a0   : > { %v1222_v57 = vmax.f32 %v1206_v52, 0.0  ;;  %v1043_v58 = vpop.f32.mrf.mxu2  ;;  %v1057_v59 = vpop.f32.mrf.mxu3  ;;  %v1223_v0 = vmax.f32 %v1207_v53, 0.0 }
 0x2a1   : > { %v1170_v62 = vmul.f32 %v1146_v46, %v1043_v58  ;;  %v1171_v63 = vmul.f32 %v1147_v41, %v1057_v59  ;;  %v1185_v41 = vperm.slane %v2622_v35, 5 }
 0x2a2   : > { %v1242_v1 = vmax.f32 %v1214_v60, %v1222_v57  ;;  %v1249_v12 = vmax.f32 %v1215_v7, %v1223_v0 }
 0x2a3   : > { %v1204_v2 = vadd.f32 %v1180_v56, %v1170_v62  ;;  %v1205_v3 = vadd.f32 %v1181_v51, %v1171_v63  ;;  %v1125_v4 = vpop.f32.mrf.mxu0  ;;  %v1139_v6 = vpop.f32.mrf.mxu1 }
 0x2a4   : > { %v1243_v14 = vrot.slane %v1242_v1, 4  ;;  %v1168_v16 = vmul.f32 %v1152_v5, %v1125_v4  ;;  %v1169_v19 = vmul.f32 %v1153_v9, %v1139_v6  ;;  %v1250_v26 = vrot.slane %v1249_v12, 4 }
 0x2a5   : > { %v1221_v11 = vmax.f32 %v1205_v3, 0.0  ;;  %v1220_v13 = vmax.f32 %v1204_v2, 0.0 }
 0x2a6   : > { %v1244_v28 = vmax.f32 %v1242_v1, %v1243_v14  ;;  %v1202_v29 = vadd.f32 %v1186_v17, %v1168_v16  ;;  %v1203_v34 = vadd.f32 %v1187_v20, %v1169_v19  ;;  %v1251_v42 = vmax.f32 %v1249_v12, %v1250_v26 }
 0x2a7   : > { %v1235_v15 = vmax.f32 %v1213_v10, %v1221_v11  ;;  %v1228_v27 = vmax.f32 %v1212_v18, %v1220_v13 }
 0x2a8   : > { %v1097_v21 = vpop.f32.mrf.mxu2  ;;  %v1111_v23 = vpop.f32.mrf.mxu3  ;;  %v1245_v45 = vrot.slane %v1244_v28, 2  ;;  %v1218_v46 = vmax.f32 %v1202_v29, 0.0  ;;  %v1219_v47 = vmax.f32 %v1203_v34, 0.0  ;;  %v1252_v57 = vrot.slane %v1251_v42, 2 }
 0x2a9   : > { %v1236_v24 = vrot.slane %v1235_v15, 4  ;;  %v1166_v36 = vmul.f32 %v1150_v22, %v1097_v21  ;;  %v1167_v40 = vmul.f32 %v1151_v25, %v1111_v23  ;;  %v1229_v43 = vrot.slane %v1228_v27, 4 }
 0x2aa   : > { %v1246_v62 = vmax.f32 %v1244_v28, %v1245_v45  ;;  %v1253_v6 = vmax.f32 %v1251_v42, %v1252_v57 }
 0x2ab   : > { %v1127_v32 = vpop.f32.mrf.mxu0  ;;  %v1141_v33 = vpop.f32.mrf.mxu1  ;;  %v1237_v39 = vmax.f32 %v1235_v15, %v1236_v24  ;;  %v1200_v48 = vadd.f32 %v1184_v30, %v1166_v36  ;;  %v1201_v54 = vadd.f32 %v1185_v41, %v1167_v40  ;;  %v1230_v58 = vmax.f32 %v1228_v27, %v1229_v43 }
 0x2ac   : > { %v1176_v37 = vmul.f32 %v1152_v5, %v1127_v32  ;;  %v1177_v38 = vmul.f32 %v1153_v9, %v1141_v33  ;;  %v1247_v14 = vrot.slane %v1246_v62, 1  ;;  %v1254_v18 = vrot.slane %v1253_v6, 1 }
 0x2ad   : > { %v1238_v53 = vrot.slane %v1237_v39, 2  ;;  %v1216_v63 = vmax.f32 %v1200_v48, 0.0  ;;  %v1217_v3 = vmax.f32 %v1201_v54, 0.0  ;;  %v1231_v7 = vrot.slane %v1230_v58, 2 }
 0x2ae   : > { %v1210_v44 = vadd.f32 %v1186_v17, %v1176_v37  ;;  %v1211_v31 = vadd.f32 %v1187_v20, %v1177_v38  ;;  %v1248_v29 = vmax.f32 %v1246_v62, %v1247_v14 }
 0x2af   : > { %v1239_v2 = vmax.f32 %v1237_v39, %v1238_v53  ;;  %v1232_v19 = vmax.f32 %v1230_v58, %v1231_v7 }
 0x2b0   : > { %v1226_v49 = vmax.f32 %v1210_v44, 0.0  ;;  %v1227_v50 = vmax.f32 %v1211_v31, 0.0  ;;  %v1099_v51 = vpop.f32.mrf.mxu2  ;;  %v1113_v52 = vpop.f32.mrf.mxu3 }
 0x2b1   : > { %v1174_v55 = vmul.f32 %v1150_v22, %v1099_v51  ;;  %v1175_v56 = vmul.f32 %v1151_v25, %v1113_v52  ;;  %v1240_v15 = vrot.slane %v1239_v2, 1  ;;  %v1233_v32 = vrot.slane %v1232_v19, 1 }
 0x2b2   : > { %v1270_v59 = vmax.f32 %v1218_v46, %v1226_v49  ;;  %v1277_v35 = vmax.f32 %v1219_v47, %v1227_v50 }
 0x2b3   : > { %v1208_v60 = vadd.f32 %v1184_v30, %v1174_v55  ;;  %v1209_v61 = vadd.f32 %v1185_v41, %v1175_v56  ;;  %v1241_v26 = vmax.f32 %v1239_v2, %v1240_v15  ;;  %v1255_v30 = vmax.f32 %v1253_v6, %v1254_v18 }
 0x2b4   : > { %v1271_v0 = vrot.slane %v1270_v59, 4  ;;  %v1278_v1 = vrot.slane %v1277_v35, 4  ;;  %v1299_v41 = vrot.slane %v1248_v29, 6  ;;  %v1234_v43 = vmax.f32 %v1232_v19, %v1233_v32 }
 0x2b5   : > { %v1224_v4 = vmax.f32 %v1208_v60, 0.0  ;;  %v1225_v5 = vmax.f32 %v1209_v61, 0.0  ;;  %v1298_v38 = vrot.slane %v1241_v26, 7  ;;  %v1300_v42 = vrot.slane %v1255_v30, 5 }
 0x2b6   : > { %v1272_v8 = vmax.f32 %v1270_v59, %v1271_v0  ;;  %v1279_v9 = vmax.f32 %v1277_v35, %v1278_v1 }
 0x2b7   : > { %v1256_v10 = vmax.f32 %v1216_v63, %v1224_v4  ;;  %v1263_v11 = vmax.f32 %v1217_v3, %v1225_v5  ;;  %v1306_v47 = vsel %vm1305_vm3, %v1234_v43, %v1298_v38  ;;  %v1308_v50 = vsel %vm1307_vm4, %v1299_v41, %v1300_v42 }
 0x2b8   : > { %v1273_v12 = vrot.slane %v1272_v8, 2  ;;  %v1280_v13 = vrot.slane %v1279_v9, 2  ;;  %v1309_v53 = vsel %vm550_vm0, %v1306_v47, %v1308_v50 }
 0x2b9   : > { %v1257_v16 = vrot.slane %v1256_v10, 4  ;;  %v1264_v17 = vrot.slane %v1263_v11, 4 }
 0x2ba   : > { %v1274_v20 = vmax.f32 %v1272_v8, %v1273_v12  ;;  %v1281_v21 = vmax.f32 %v1279_v9, %v1280_v13 }
 0x2bb   : > { %v1258_v22 = vmax.f32 %v1256_v10, %v1257_v16  ;;  %v1265_v23 = vmax.f32 %v1263_v11, %v1264_v17 }
 0x2bc   : > { %v1275_v24 = vrot.slane %v1274_v20, 1  ;;  %v1282_v25 = vrot.slane %v1281_v21, 1 }
 0x2bd   : > { %v1259_v27 = vrot.slane %v1258_v22, 2  ;;  %v1266_v28 = vrot.slane %v1265_v23, 2 }
 0x2be   : > { %v1276_v33 = vmax.f32 %v1274_v20, %v1275_v24  ;;  %v1283_v34 = vmax.f32 %v1281_v21, %v1282_v25 }
 0x2bf   : > { %v1260_v36 = vmax.f32 %v1258_v22, %v1259_v27  ;;  %v1267_v37 = vmax.f32 %v1265_v23, %v1266_v28 }
 0x2c0   : > { %v1303_v44 = vrot.slane %v1276_v33, 2  ;;  %v1304_v31 = vrot.slane %v1283_v34, 1 }
 0x2c1   : > { %v1261_v39 = vrot.slane %v1260_v36, 1  ;;  %v1268_v40 = vrot.slane %v1267_v37, 1 }
 0x2c2   : > { %v1313_v51 = vsel %vm1312_vm5, %v1303_v44, %v1304_v31 }
 0x2c3   : > { %v1262_v45 = vmax.f32 %v1260_v36, %v1261_v39  ;;  %v1269_v46 = vmax.f32 %v1267_v37, %v1268_v40 }
 0x2c5   : > { %v1301_v48 = vrot.slane %v1262_v45, 4  ;;  %v1302_v49 = vrot.slane %v1269_v46, 3 }
 0x2c7   : > { %v1311_v52 = vsel %vm1310_vm6, %v1301_v48, %v1302_v49 }
 0x2c8   : > { %v1315_v54 = vsel %vm1314_vm7, %v1311_v52, %v1313_v51 }
 0x2c9   : > { %v1317_v55 = vsel %vm1316_vm8, %v1309_v53, %v1315_v54 }
 0x2ca   : > { %v1319_v56 = vmax.f32 %v1317_v55, 0.0 }
 0x2cc   : > { %1320 = vst [vmem:[%s523_s16] sm:$0xff] %v1319_v56 }
 0x2cd   : > { %2319 = shalt.err (!%p2316_p13)
}
 0x2ce   : > { %1903 = dma.vmem_to_hbm [thread:$0]  (%p2571_p0), %s1336_s28, 128, %s1338_s3, %s1322_s12  }
 0x2cf PF: > { %s1349_s19 = sand.u32 1, %s2370_s13   ;;  %p1935_p2 = pnand %p1509_p4, %p2578_p6 }
 0x2d0   : > { %s1350_s24 = scalar_lea.sflag [#allocation4], %s1349_s19 }
 0x2d1   : > { %p1936_p5 = pneg %p1935_p2 }
 0x2d3   : > { %2365 = dma.done.wait (%p1936_p5), %s1350_s24, 128  }
 0x2d4   : > { %2367 = vsyncadd (%p1936_p5), %s1350_s24, 4294967168  ;;  %s30_s18 = sadd.s32 1, %s2390_s18   ;;  %s2708_s13 = smov %s2374_s14 }
 0x2d5   : > { %p27_p7 = scmp.ge.s32.totalorder %s30_s18, 4   ;;  %s2709_s14 = smov %s2378_s15 }
 0x2d6   : > { %s2710_s15 = smov %s2576_s5  ;;  %s2711_s16 = smov %s2386_s17 }
 0x2d7   : > { %s2712_s17 = smov %s2714_s21  ;;  %29 = sbr.rel (!%p27_p7) target bundleno = 16 (0x10), region = 141 }
 0x2dc   :  { %1356 = vsyncpa [#allocation3], 1 }
 0x2dd   :  { %1358 = vsyncpa [#allocation3 + $0x1], 1 }
 0x2de   :  { %1359 = vsyncpa [#allocation6], 1 }
 0x2df   :  { %1360 = vsyncpa [#allocation9], 1 }
 0x2e0   :  { %1361 = vsyncpa [#allocation12], 1 }
 0x2e1   :  { %1362 = vsyncpa [#allocation15], 1 }
 0x2e2   :  { %1363 = vsyncpa [#allocation4], 1 }
 0x2e3   :  { %1365 = vsyncpa [#allocation4 + $0x1], 1 }

</bundles_post_ra>
